<compile_context>
chip_gen: v5e
topology: v5e:2x2
jax: 0.10.0
libtpu: 0.0.40
codegen_flags: <defaults>
</compile_context>

<pallas_src>
import functools

import jax
import jax.numpy as jnp
from jax import lax
from jax.experimental import pallas as pl
from jax.experimental.pallas import tpu as pltpu


def _round_up(a, b):
    return ((a + b - 1) // b) * b


def _fc_leakyrelu_kernel(x_ref, w_ref, b_ref, o_ref):
    """One (tm, tn) output tile; o_ref itself is the f32 accumulator."""
    k = pl.program_id(2)

    @pl.when(k == 0)
    def _():
        o_ref[...] = jnp.zeros_like(o_ref)

    # x tile: (tm, tk); w tile: (tk, tn)  -> canonical MXU (m,k)x(k,n).
    o_ref[...] += jnp.dot(x_ref[...], w_ref[...],
                          preferred_element_type=jnp.float32)

    @pl.when(k == pl.num_programs(2) - 1)
    def _():
        y = o_ref[...] + b_ref[...]          # bias broadcast (1, tn), f32
        o_ref[...] = jnp.maximum(y, 0.1 * y)  # LeakyReLU(0.1): single vmax


@functools.partial(jax.jit,
                   static_argnames=("tm", "tn", "tk", "compute_dtype"))
def fully_connected(x, weight, bias, *, tm=512, tn=1024, tk=1024,
                    compute_dtype=jnp.bfloat16):
    """
    x      : (N, C)  float32
    weight : (K, C)  float32   (PyTorch nn.Linear weight layout)
    bias   : (K,)    float32
    returns: (N, K)  float32
    """
    N, C = x.shape
    K = weight.shape[0]

    # Clamp tiles to the aligned problem size: small problems -> single tile,
    # large problems -> requested tiling.  bf16 operands pack 16 rows/sublane
    # group, so align tm to 16 in that case.
    m_align = 16 if compute_dtype == jnp.bfloat16 else 8
    tm = min(tm, _round_up(N, m_align))
    tn = min(tn, _round_up(K, 128))
    tk = min(tk, _round_up(C, 128))

    Np, Kp, Cp = _round_up(N, tm), _round_up(K, tn), _round_up(C, tk)

    # x: cast (and pad only if needed). Zero padding is safe: padded rows/cols
    # contribute nothing to the contraction and are sliced off below.
    xp = x.astype(compute_dtype)
    if Np != N or Cp != C:
        xp = jnp.pad(xp, ((0, Np - N), (0, Cp - C)))

    # weight: one fused transpose + cast (+ pad) pass to (Cp, Kp).
    wt = weight.T.astype(compute_dtype)
    if Cp != C or Kp != K:
        wt = jnp.pad(wt, ((0, Cp - C), (0, Kp - K)))

    bp = bias if Kp == K else jnp.pad(bias, (0, Kp - K))
    b2d = bp.reshape(1, Kp).astype(jnp.float32)

    grid = (Np // tm, Kp // tn, Cp // tk)   # k (contraction) MUST be last.

    in_bytes = jnp.dtype(compute_dtype).itemsize
    cost = pl.CostEstimate(
        flops=2 * Np * Kp * Cp,
        transcendentals=0,
        # Honest tiled-traffic estimate: x and weight are re-streamed once per
        # opposing output-tile column/row; output written once.
        bytes_accessed=(in_bytes * (Np * Cp * (Kp // tn)
                                    + Kp * Cp * (Np // tm))
                        + 4 * Np * Kp),
    )

    out = pl.pallas_call(
        _fc_leakyrelu_kernel,
        out_shape=jax.ShapeDtypeStruct((Np, Kp), jnp.float32),
        grid_spec=pltpu.PrefetchScalarGridSpec(
            num_scalar_prefetch=0,
            grid=grid,
            in_specs=[
                pl.BlockSpec((tm, tk), lambda i, j, k: (i, k)),   # x
                pl.BlockSpec((tk, tn), lambda i, j, k: (k, j)),   # weight^T
                pl.BlockSpec((1, tn), lambda i, j, k: (0, j)),    # bias
            ],
            # Constant in k -> resident output tile acts as the accumulator.
            out_specs=pl.BlockSpec((tm, tn), lambda i, j, k: (i, j)),
        ),
        compiler_params=pltpu.CompilerParams(
            # i, j parallel (megacore/v7x 2-TC sharding); k is the reduction.
            dimension_semantics=("parallel", "parallel", "arbitrary"),
            # Safe on v7x's 64 MiB per-TC VMEM; default tiles use ~10-18 MiB.
            vmem_limit_bytes=48 * 1024 * 1024,
        ),
        cost_estimate=cost,
    )(xp, wt, b2d)

    if Np != N or Kp != K:
        out = out[:N, :K]
    return out


def fully_connected_ref(x, weight, bias):
    y = x @ weight.T + bias
    return jnp.where(y > 0, y, 0.1 * y)


if __name__ == "__main__":
    key = jax.random.PRNGKey(0)

    # Case 1: small N x C -> N x K forward, f32 compute path (bit-faithful to
    # the PyTorch module), single tile after clamping.
    N, C, K = 8, 32, 64
    kx, kw, kb = jax.random.split(key, 3)
    bound = 1.0 / (C ** 0.5)
    x = jax.random.normal(kx, (N, C), dtype=jnp.float32)
    weight = jax.random.uniform(kw, (K, C), minval=-bound, maxval=bound,
                                dtype=jnp.float32)
    bias = jax.random.uniform(kb, (K,), minval=-bound, maxval=bound,
                              dtype=jnp.float32)

    out = jax.block_until_ready(
        fully_connected(x, weight, bias, compute_dtype=jnp.float32))
    ref = fully_connected_ref(x, weight, bias)
    assert out.shape == (N, K)
    assert jnp.allclose(out, ref, atol=1e-5, rtol=1e-5), "mismatch (f32 case)"

    # Case 2: non-divisible shapes, small tiles, default bf16 operands.
    # Exercises the tiled grid, resident-output accumulation, padding/slicing.
    N2, C2, K2 = 72, 300, 200
    kx2, kw2, kb2 = jax.random.split(jax.random.PRNGKey(1), 3)
    bound2 = 1.0 / (C2 ** 0.5)
    x2 = jax.random.normal(kx2, (N2, C2), dtype=jnp.float32)
    w2 = jax.random.uniform(kw2, (K2, C2), minval=-bound2, maxval=bound2,
                            dtype=jnp.float32)
    b2 = jax.random.uniform(kb2, (K2,), minval=-bound2, maxval=bound2,
                            dtype=jnp.float32)
    ref2 = fully_connected_ref(x2, w2, b2)

    out2_bf16 = jax.block_until_ready(
        fully_connected(x2, w2, b2, tm=32, tn=128, tk=128))
    assert out2_bf16.shape == (N2, K2)
    assert jnp.allclose(out2_bf16, ref2, atol=3e-2, rtol=3e-2), \
        "mismatch (tiled bf16 case)"

    # Case 3: same shapes, f32 compute path, tight tolerance on the tiled grid.
    out2_f32 = jax.block_until_ready(
        fully_connected(x2, w2, b2, tm=32, tn=128, tk=128,
                        compute_dtype=jnp.float32))
    assert jnp.allclose(out2_f32, ref2, atol=1e-4, rtol=1e-4), \
        "mismatch (tiled f32 case)"

    print("KERNEL_OK")
</pallas_src>

<mosaic_0001>
module attributes {stable_mosaic.version = 11 : i64} {
  func.func @_fc_leakyrelu_kernel(%arg0: i32, %arg1: i32, %arg2: i32, %arg3: memref<8x128xf32, #tpu.memory_space<vmem>>, %arg4: memref<128x128xf32, #tpu.memory_space<vmem>>, %arg5: memref<1x128xf32, #tpu.memory_space<vmem>>, %arg6: memref<8x128xf32, #tpu.memory_space<vmem>>) attributes {dimension_semantics = [#tpu.dimension_semantics<parallel>, #tpu.dimension_semantics<parallel>, #tpu.dimension_semantics<arbitrary>], iteration_bounds = array<i64: 1, 1, 1>, scalar_prefetch = 0 : i64, scratch_operands = 0 : i64, tpu.core_type = #tpu.core_type<tc>, window_params = [{transform_indices = @transform_0, window_bounds = array<i64: 8, 128>}, {transform_indices = @transform_1, window_bounds = array<i64: 128, 128>}, {transform_indices = @transform_2, window_bounds = array<i64: 1, 128>}, {transform_indices = @transform_3, window_bounds = array<i64: 8, 128>}]} {
    %c0_i32 = arith.constant 0 : i32
    %0 = arith.cmpi eq, %arg2, %c0_i32 : i32
    %1 = arith.extui %0 : i1 to i32
    %c0_i32_0 = arith.constant 0 : i32
    %2 = arith.cmpi ne, %1, %c0_i32_0 : i32
    scf.if %2 {
      %cst_10 = arith.constant 0.000000e+00 : f32
      %12 = vector.broadcast %cst_10 : f32 to vector<8x128xf32>
      %c0_11 = arith.constant 0 : index
      %c0_12 = arith.constant 0 : index
      %13 = vector.load %arg6[%c0_11, %c0_12] : memref<8x128xf32, #tpu.memory_space<vmem>>, vector<8x128xf32>
      tpu.vector_store %arg6[%c0_11, %c0_12], %12 {strides = array<i32>} : memref<8x128xf32, #tpu.memory_space<vmem>>, vector<8x128xf32>,
    } else {
    }
    %c0 = arith.constant 0 : index
    %c0_1 = arith.constant 0 : index
    %3 = vector.load %arg6[%c0, %c0_1] : memref<8x128xf32, #tpu.memory_space<vmem>>, vector<8x128xf32>
    %c0_2 = arith.constant 0 : index
    %c0_3 = arith.constant 0 : index
    %4 = vector.load %arg3[%c0_2, %c0_3] : memref<8x128xf32, #tpu.memory_space<vmem>>, vector<8x128xf32>
    %c0_4 = arith.constant 0 : index
    %c0_5 = arith.constant 0 : index
    %5 = vector.load %arg4[%c0_4, %c0_5] : memref<128x128xf32, #tpu.memory_space<vmem>>, vector<128x128xf32>
    %cst = arith.constant dense<0.000000e+00> : vector<8x128xf32>
    %6 = tpu.matmul %4, %5, %cst {dimension_numbers = #tpu.dot_dimension_numbers<[1], [0], [0], [1], [0, 0, 1, 1], [], []>} : vector<8x128xf32>, vector<128x128xf32>, vector<8x128xf32> -> vector<8x128xf32>
    %7 = arith.addf %3, %6 : vector<8x128xf32>
    %c0_6 = arith.constant 0 : index
    %c0_7 = arith.constant 0 : index
    %8 = vector.load %arg6[%c0_6, %c0_7] : memref<8x128xf32, #tpu.memory_space<vmem>>, vector<8x128xf32>
    tpu.vector_store %arg6[%c0_6, %c0_7], %7 {strides = array<i32>} : memref<8x128xf32, #tpu.memory_space<vmem>>, vector<8x128xf32>,
    %c0_i32_8 = arith.constant 0 : i32
    %9 = arith.cmpi eq, %arg2, %c0_i32_8 : i32
    %10 = arith.extui %9 : i1 to i32
    %c0_i32_9 = arith.constant 0 : i32
    %11 = arith.cmpi ne, %10, %c0_i32_9 : i32
    scf.if %11 {
      %c0_10 = arith.constant 0 : index
      %c0_11 = arith.constant 0 : index
      %12 = vector.load %arg6[%c0_10, %c0_11] : memref<8x128xf32, #tpu.memory_space<vmem>>, vector<8x128xf32>
      %c0_12 = arith.constant 0 : index
      %c0_13 = arith.constant 0 : index
      %13 = vector.load %arg5[%c0_12, %c0_13] : memref<1x128xf32, #tpu.memory_space<vmem>>, vector<1x128xf32>
      %14 = vector.broadcast %13 : vector<1x128xf32> to vector<8x128xf32>
      %15 = arith.addf %12, %14 : vector<8x128xf32>
      %cst_14 = arith.constant 1.000000e-01 : f32
      %16 = vector.broadcast %cst_14 : f32 to vector<8x128xf32>
      %17 = arith.mulf %16, %15 : vector<8x128xf32>
      %18 = arith.maximumf %15, %17 : vector<8x128xf32>
      %c0_15 = arith.constant 0 : index
      %c0_16 = arith.constant 0 : index
      %19 = vector.load %arg6[%c0_15, %c0_16] : memref<8x128xf32, #tpu.memory_space<vmem>>, vector<8x128xf32>
      tpu.vector_store %arg6[%c0_15, %c0_16], %18 {strides = array<i32>} : memref<8x128xf32, #tpu.memory_space<vmem>>, vector<8x128xf32>,
    } else {
    }
    return
  }
  func.func @transform_0(%arg0: i32, %arg1: i32, %arg2: i32) -> (i32, i32) {
    %c0_i32 = arith.constant 0 : i32
    return %arg0, %arg2 : i32, i32
  }
  func.func @transform_1(%arg0: i32, %arg1: i32, %arg2: i32) -> (i32, i32) {
    %c0_i32 = arith.constant 0 : i32
    return %arg2, %arg1 : i32, i32
  }
  func.func @transform_2(%arg0: i32, %arg1: i32, %arg2: i32) -> (i32, i32) {
    %c0_i32 = arith.constant 0 : i32
    %c0_i32_0 = arith.constant 0 : i32
    return %c0_i32, %arg1 : i32, i32
  }
  func.func @transform_3(%arg0: i32, %arg1: i32, %arg2: i32) -> (i32, i32) {
    %c0_i32 = arith.constant 0 : i32
    return %arg0, %arg1 : i32, i32
  }
}

</mosaic_0001>

<bundles_post_ra>
// kernel: fully_connected.1
= control target key start
LH: loop header
LB: loop body
LE: loop exit
PB: predicated region body
PF: predicated region fallthrough
CT: control target
= control target key end

     0   :  { %s195_s0 = inlined_call_operand.vmem [shape: f32[8,128], index: 0, kind: input, shape index: {}]   ;;  %s196_s1 = inlined_call_operand.vmem [shape: f32[128,128], index: 1, kind: input, shape index: {}]   ;;  %s197_s2 = inlined_call_operand.vmem [shape: f32[1,128], index: 2, kind: input, shape index: {}]   ;;  %s198_s3 = inlined_call_operand.hbm [shape: f32[8,128], index: 3, kind: output, shape index: {}]  }
   0x1   :  { %v37_v0 = vld [vmem:[%s196_s1 + $0x78] sm:$0xff]  ;;  %v36_v1 = vld [vmem:[%s196_s1 + $0x70] sm:$0xff]  ;;  %v35_v2 = vld [vmem:[%s196_s1 + $0x68] sm:$0xff] }
   0x2   :  { %38 = vmatpush.msra.mxu0 %v37_v0  ;;  %v34_v3 = vld [vmem:[%s196_s1 + $0x60] sm:$0xff] }
   0x4   :  { %39 = vmatpush.msra.mxu0 %v36_v1 }
   0x6   :  { %40 = vmatpush.msra.mxu0 %v35_v2 }
   0x7   :  { %8 = vsyncpa [#allocation3], 0  ;;  %v33_v4 = vld [vmem:[%s196_s1 + $0x58] sm:$0xff]  ;;  %v32_v5 = vld [vmem:[%s196_s1 + $0x50] sm:$0xff]  ;;  %s117_s21 = smov [#allocation2]   ;;  %s79_s25 = sshll.u32 %s198_s3, 4  ;;  %s80_s25 = int_to_ptr.hbm [resolvable:$true] %s79_s25 }
   0x8   :  { %41 = vmatpush.msra.mxu0 %v34_v3  ;;  %v31_v6 = vld [vmem:[%s196_s1 + $0x48] sm:$0xff]  ;;  %v30_v7 = vld [vmem:[%s196_s1 + $0x40] sm:$0xff]  ;;  %v29_v8 = vld [vmem:[%s196_s1 + $0x38] sm:$0xff]  ;;  %s77_s22 = sshll.u32 %s117_s21, 4  ;;  %s78_s22 = int_to_ptr.vmem [resolvable:$true] %s77_s22 }
   0x9   :  { %v28_v9 = vld [vmem:[%s196_s1 + $0x30] sm:$0xff]  ;;  %v27_v10 = vld [vmem:[%s196_s1 + $0x28] sm:$0xff]  ;;  %v26_v11 = vld [vmem:[%s196_s1 + $0x20] sm:$0xff] }
   0xa   :  { %42 = vmatpush.msra.mxu0 %v33_v4  ;;  %v25_v12 = vld [vmem:[%s196_s1 + $0x18] sm:$0xff]  ;;  %v24_v13 = vld [vmem:[%s196_s1 + $0x10] sm:$0xff]  ;;  %v23_v14 = vld [vmem:[%s196_s1 + $0x8] sm:$0xff] }
   0xb   :  { %v22_v15 = vld [vmem:[%s196_s1] sm:$0xff] }
   0xc   :  { %43 = vmatpush.msra.mxu0 %v32_v5  ;;  %v21_v16 = vld [vmem:[%s195_s0] sm:$0xff] }
   0xd   :  { %v90_v17 = vld [vmem:[%s197_s2] ss:$0 sm:$0xff] }
   0xe   :  { %44 = vmatpush.msra.mxu0 %v31_v6 }
  0x10   :  { %45 = vmatpush.msra.mxu0 %v30_v7 }
  0x12   :  { %46 = vmatpush.msra.mxu0 %v29_v8 }
  0x14   :  { %47 = vmatpush.msra.mxu0 %v28_v9 }
  0x16   :  { %48 = vmatpush.msra.mxu0 %v27_v10 }
  0x18   :  { %49 = vmatpush.msra.mxu0 %v26_v11 }
  0x1a   :  { %50 = vmatpush.msra.mxu0 %v25_v12 }
  0x1c   :  { %51 = vmatpush.msra.mxu0 %v24_v13 }
  0x1e   :  { %52 = vmatpush.msra.mxu0 %v23_v14 }
  0x20   :  { %53 = vmatpush.msra.mxu0 %v22_v15 }
  0x21   :  { %54 = vmatmul.f32.vlgmr.msra.gmra.mxu0 %v21_v16 }
  0x9e   :  { %v55_v18 = vpop.f32.mrf.mxu0 }
  0x9f   :  { %v68_v19 = vadd.f32 %v90_v17, %v55_v18 }
  0xa1   :  { %v69_v20 = vmul.f32 0.1, %v68_v19 }
  0xa3   :  { %v70_v21 = vmax.f32 %v68_v19, %v69_v20 }
  0xa5   :  { %71 = vst [vmem:[#allocation2] sm:$0xff] %v70_v21 }
  0xa6   :  { %82 = dma.vmem_to_hbm [thread:$0]  %s78_s22, 128, %s80_s25, [#allocation3]  }
  0xa7   :  { %115 = dma.done.wait [#allocation3], 128  }
  0xa8   :  { %116 = vsyncadd [#allocation3], 4294967168 }
  0xa9   :  { %87 = vsyncpa [#allocation3], 1 }

</bundles_post_ra>
